<compile_context>
chip_gen: v7x
topology: tpu7x:2x2x1
jax: 0.10.0
libtpu: 0.0.40
codegen_flags: <defaults>
</compile_context>

<pallas_src>
import jax
import jax.numpy as jnp
from jax import lax
from jax.experimental import pallas as pl
from jax.experimental.pallas import tpu as pltpu

EPS = 1e-5
LANE = 128
MXU_DTYPE = jnp.bfloat16       # MXU operand dtype / streamed activation dtype
ACT_DTYPE = jnp.bfloat16       # HBM intermediate activation dtype
ROW_BLOCK_CAP = 2048           # v7x-safe; v6e (128 MiB VMEM) could go larger
VMEM_LIMIT = 32 * 1024 * 1024  # sized against v7x's 64 MiB / TensorCore


def _round_up(n, m):
    return ((n + m - 1) // m) * m


def _pick_row_block(m, hw, cap=ROW_BLOCK_CAP):
    """Largest multiple-of-8 divisor of m that is <= cap (fallback: hw / m)."""
    best = 0
    for t in range(8, min(m, cap) + 1, 8):
        if m % t == 0:
            best = t
    if best == 0:
        best = hw if m % hw == 0 else m
    return best


# --------------------------- kernels ---------------------------------------

def _conv1x1_stats_kernel(x_ref, w_ref, h_ref, sum_ref, ssq_ref):
    """h = x @ w1 (bf16 MXU, f32 acc); per-block partial sum / sum-of-squares."""
    h = jnp.dot(x_ref[...], w_ref[...], preferred_element_type=jnp.float32)
    sum_ref[...] = jnp.sum(h, axis=0, keepdims=True).reshape(1, 1, -1)
    ssq_ref[...] = jnp.sum(h * h, axis=0, keepdims=True).reshape(1, 1, -1)
    h_ref[...] = h.astype(h_ref.dtype)


def _conv3x3_stats_kernel(h1_ref, s1_ref, t1_ref, w2_ref,
                          h2_ref, sum_ref, ssq_ref, ypad_ref, acc_ref):
    """BN1(affine)+ReLU fused in, then 3x3 conv as 9 halo-shifted matmuls."""
    _, H, W, C = h1_ref.shape
    HW = H * W

    # BN1 apply + ReLU (f32 math), then down to bf16 for the MXU.
    y = (h1_ref[0].astype(jnp.float32) * s1_ref[...].reshape(1, 1, C)
         + t1_ref[...].reshape(1, 1, C))
    y = jnp.maximum(y, 0.0).astype(MXU_DTYPE)

    # Build the three dx-shifted, H-padded variants once per image.  The 9 tap
    # loads below then slice only the major H axis -> no per-tap relayout, and
    # the zero border rows are (re)written as part of these stores, so no
    # separate scratch zeroing is needed (parallel-grid safe).
    zrow = jnp.zeros((1, W, C), MXU_DTYPE)
    zcol = jnp.zeros((H, 1, C), MXU_DTYPE)
    y_dx0 = jnp.concatenate([zcol, y[:, :W - 1, :]], axis=1)   # input col j-1
    y_dx2 = jnp.concatenate([y[:, 1:, :], zcol], axis=1)       # input col j+1
    ypad_ref[0] = jnp.concatenate([zrow, y_dx0, zrow], axis=0)
    ypad_ref[1] = jnp.concatenate([zrow, y,     zrow], axis=0)
    ypad_ref[2] = jnp.concatenate([zrow, y_dx2, zrow], axis=0)

    # 3x3 stride-1 conv == 9 shifted (H*W, C) x (C, C) MXU matmuls; accumulate
    # into an explicit VMEM f32 scratch (bounded live range).
    for t in range(9):
        dy, dx = t // 3, t % 3
        patch = ypad_ref[dx, pl.ds(dy, H), :, :].reshape(HW, C)
        contrib = jnp.dot(patch, w2_ref[t], preferred_element_type=jnp.float32)
        if t == 0:
            acc_ref[...] = contrib
        else:
            acc_ref[...] += contrib

    acc = acc_ref[...]
    sum_ref[...] = jnp.sum(acc, axis=0, keepdims=True).reshape(1, 1, -1)
    ssq_ref[...] = jnp.sum(acc * acc, axis=0, keepdims=True).reshape(1, 1, -1)
    h2_ref[...] = acc.astype(h2_ref.dtype)


def _bn_relu_conv1x1_stats_kernel(h2_ref, s2_ref, t2_ref, w_ref,
                                  h3_ref, sum_ref, ssq_ref):
    """BN2(affine)+ReLU fused in, then 1x1 conv (w3); per-block BN3 partials."""
    y = jnp.maximum(h2_ref[...].astype(jnp.float32) * s2_ref[...] + t2_ref[...],
                    0.0)
    h = jnp.dot(y.astype(MXU_DTYPE), w_ref[...],
                preferred_element_type=jnp.float32)
    sum_ref[...] = jnp.sum(h, axis=0, keepdims=True).reshape(1, 1, -1)
    ssq_ref[...] = jnp.sum(h * h, axis=0, keepdims=True).reshape(1, 1, -1)
    h3_ref[...] = h.astype(h3_ref.dtype)


def _bn_add_relu_kernel(h3_ref, s3_ref, t3_ref, res_ref, o_ref):
    """BN3(affine) + residual add + ReLU (pure elementwise)."""
    h = h3_ref[...].astype(jnp.float32) * s3_ref[...] + t3_ref[...]
    o_ref[...] = jnp.maximum(h + res_ref[...].astype(jnp.float32),
                             0.0).astype(o_ref.dtype)


# --------------------------- wrapper ----------------------------------------

def _affine_from_stats(ssum, ssq, gamma, beta, count):
    """Per-channel BN (training mode, biased var): y = scale*h + shift."""
    mean = ssum / count
    var = jnp.maximum(ssq / count - mean * mean, 0.0)
    scale = gamma * lax.rsqrt(var + EPS)
    shift = beta - mean * scale
    return scale, shift


def bottleneck_forward(x_nchw, params):
    N, Cin, H, W = x_nchw.shape
    P = params["w1"].shape[0]                 # planes
    Cout = params["w3"].shape[0]              # planes * expansion
    assert Cin == Cout, "downsample=None requires inplanes == planes*expansion"

    HW = H * W
    M = N * HW
    Cin_p = _round_up(Cin, LANE)
    P_p = _round_up(P, LANE)
    Cout_p = _round_up(Cout, LANE)
    assert Cin_p == Cout_p

    TM = _pick_row_block(M, HW)               # row block for stages 1/3/4
    G = M // TM                               # row-block grid size

    # ---- layout glue: NCHW -> flattened NHWC, lane-width channel padding ----
    x = jnp.transpose(x_nchw, (0, 2, 3, 1)).reshape(M, Cin)
    x = jnp.pad(x, ((0, 0), (0, Cin_p - Cin))).astype(MXU_DTYPE)

    w1 = params["w1"].reshape(P, Cin).T                                # (Cin, P)
    w1 = jnp.pad(w1, ((0, Cin_p - Cin), (0, P_p - P))).astype(MXU_DTYPE)
    w2 = jnp.transpose(params["w2"], (2, 3, 1, 0)).reshape(9, P, P)    # (tap,in,out)
    w2 = jnp.pad(w2, ((0, 0), (0, P_p - P), (0, P_p - P))).astype(MXU_DTYPE)
    w3 = params["w3"].reshape(Cout, P).T                               # (P, Cout)
    w3 = jnp.pad(w3, ((0, P_p - P), (0, Cout_p - Cout))).astype(MXU_DTYPE)

    def _pad_vec(v, n):
        return jnp.pad(v.astype(jnp.float32), (0, n - v.shape[0])).reshape(1, n)

    g1, b1 = _pad_vec(params["g1"], P_p), _pad_vec(params["b1"], P_p)
    g2, b2 = _pad_vec(params["g2"], P_p), _pad_vec(params["b2"], P_p)
    g3, b3 = _pad_vec(params["g3"], Cout_p), _pad_vec(params["b3"], Cout_p)

    cparams = pltpu.CompilerParams(dimension_semantics=("parallel",),
                                   vmem_limit_bytes=VMEM_LIMIT)

    row_cin = pl.BlockSpec((TM, Cin_p), lambda i: (i, 0))
    row_p = pl.BlockSpec((TM, P_p), lambda i: (i, 0))
    row_cout = pl.BlockSpec((TM, Cout_p), lambda i: (i, 0))
    img_p = pl.BlockSpec((HW, P_p), lambda n: (n, 0))
    vec_p = pl.BlockSpec((1, P_p), lambda i: (0, 0))
    vec_cout = pl.BlockSpec((1, Cout_p), lambda i: (0, 0))
    stat_p = pl.BlockSpec((1, 1, P_p), lambda i: (i, 0, 0))
    stat_cout = pl.BlockSpec((1, 1, Cout_p), lambda i: (i, 0, 0))

    # ---- stage 1: conv1 (1x1) + BN1 partial batch stats ----------------------
    h1, s1s, s1q = pl.pallas_call(
        _conv1x1_stats_kernel,
        grid=(G,),
        in_specs=[row_cin, pl.BlockSpec((Cin_p, P_p), lambda i: (0, 0))],
        out_specs=(row_p, stat_p, stat_p),
        out_shape=(jax.ShapeDtypeStruct((M, P_p), ACT_DTYPE),
                   jax.ShapeDtypeStruct((G, 1, P_p), jnp.float32),
                   jax.ShapeDtypeStruct((G, 1, P_p), jnp.float32)),
        compiler_params=cparams,
    )(x, w1)
    scale1, shift1 = _affine_from_stats(s1s.sum(0), s1q.sum(0), g1, b1, float(M))

    # ---- stage 2: BN1+ReLU (fused) + conv2 (3x3, bf16 VMEM halo) + BN2 stats --
    h2, s2s, s2q = pl.pallas_call(
        _conv3x3_stats_kernel,
        grid=(N,),
        in_specs=[pl.BlockSpec((1, H, W, P_p), lambda n: (n, 0, 0, 0)),
                  vec_p, vec_p,
                  pl.BlockSpec((9, P_p, P_p), lambda n: (0, 0, 0))],
        out_specs=(img_p, stat_p, stat_p),
        out_shape=(jax.ShapeDtypeStruct((M, P_p), ACT_DTYPE),
                   jax.ShapeDtypeStruct((N, 1, P_p), jnp.float32),
                   jax.ShapeDtypeStruct((N, 1, P_p), jnp.float32)),
        scratch_shapes=[pltpu.VMEM((3, H + 2, W, P_p), MXU_DTYPE),
                        pltpu.VMEM((HW, P_p), jnp.float32)],
        compiler_params=cparams,
    )(h1.reshape(N, H, W, P_p), scale1, shift1, w2)
    scale2, shift2 = _affine_from_stats(s2s.sum(0), s2q.sum(0), g2, b2, float(M))

    # ---- stage 3: BN2+ReLU (fused) + conv3 (1x1) + BN3 partial stats ----------
    h3, s3s, s3q = pl.pallas_call(
        _bn_relu_conv1x1_stats_kernel,
        grid=(G,),
        in_specs=[row_p, vec_p, vec_p,
                  pl.BlockSpec((P_p, Cout_p), lambda i: (0, 0))],
        out_specs=(row_cout, stat_cout, stat_cout),
        out_shape=(jax.ShapeDtypeStruct((M, Cout_p), ACT_DTYPE),
                   jax.ShapeDtypeStruct((G, 1, Cout_p), jnp.float32),
                   jax.ShapeDtypeStruct((G, 1, Cout_p), jnp.float32)),
        compiler_params=cparams,
    )(h2, scale2, shift2, w3)
    scale3, shift3 = _affine_from_stats(s3s.sum(0), s3q.sum(0), g3, b3, float(M))

    # ---- stage 4: BN3 + residual + ReLU (elementwise) -------------------------
    out = pl.pallas_call(
        _bn_add_relu_kernel,
        grid=(G,),
        in_specs=[row_cout, vec_cout, vec_cout, row_cin],
        out_specs=row_cout,
        out_shape=jax.ShapeDtypeStruct((M, Cout_p), jnp.float32),
        compiler_params=cparams,
    )(h3, scale3, shift3, x)

    out = out[:, :Cout].reshape(N, H, W, Cout)
    return jnp.transpose(out, (0, 3, 1, 2))                  # back to NCHW


# ----------------------------- pure-JAX reference -----------------------------

def _bn_train(h, g, b):
    m = h.mean(axis=(0, 2, 3), keepdims=True)
    v = ((h - m) ** 2).mean(axis=(0, 2, 3), keepdims=True)
    return (h - m) / jnp.sqrt(v + EPS) * g.reshape(1, -1, 1, 1) + b.reshape(1, -1, 1, 1)


def bottleneck_ref(x, p):
    dn = ("NCHW", "OIHW", "NCHW")
    h = lax.conv_general_dilated(x, p["w1"], (1, 1), "VALID", dimension_numbers=dn)
    h = jnp.maximum(_bn_train(h, p["g1"], p["b1"]), 0.0)
    h = lax.conv_general_dilated(h, p["w2"], (1, 1), ((1, 1), (1, 1)), dimension_numbers=dn)
    h = jnp.maximum(_bn_train(h, p["g2"], p["b2"]), 0.0)
    h = lax.conv_general_dilated(h, p["w3"], (1, 1), "VALID", dimension_numbers=dn)
    h = _bn_train(h, p["g3"], p["b3"])
    return jnp.maximum(h + x, 0.0)


if __name__ == "__main__":
    # inplanes == planes * expansion so the residual add is valid (downsample=None).
    N, inplanes, planes, H, W = 2, 16, 4, 16, 16
    expansion = 4

    key = jax.random.PRNGKey(0)
    ks = jax.random.split(key, 8)
    x = jax.random.normal(ks[0], (N, inplanes, H, W), jnp.float32)

    params = dict(
        w1=0.2 * jax.random.normal(ks[1], (planes, inplanes, 1, 1), jnp.float32),
        w2=0.2 * jax.random.normal(ks[2], (planes, planes, 3, 3), jnp.float32),
        w3=0.2 * jax.random.normal(ks[3], (planes * expansion, planes, 1, 1), jnp.float32),
        g1=1.0 + 0.1 * jax.random.normal(ks[4], (planes,), jnp.float32),
        b1=0.1 * jax.random.normal(ks[5], (planes,), jnp.float32),
        g2=1.0 + 0.1 * jax.random.normal(ks[6], (planes,), jnp.float32),
        b2=0.1 * jax.random.normal(ks[7], (planes,), jnp.float32),
        g3=jnp.ones((planes * expansion,), jnp.float32),
        b3=jnp.zeros((planes * expansion,), jnp.float32),
    )

    out = jax.block_until_ready(bottleneck_forward(x, params))
    assert out.shape == (N, inplanes, H, W)

    ref = bottleneck_ref(x, params)
    # bf16 MXU operands + bf16 HBM intermediates/residual introduce ~0.3-1%
    # relative error; BN math itself stays f32.
    max_abs = float(jnp.max(jnp.abs(out - ref)))
    rel_l2 = float(jnp.linalg.norm(out - ref) / (jnp.linalg.norm(ref) + 1e-12))
    assert rel_l2 < 1e-2 and max_abs < 5e-2, (
        f"mismatch vs reference: max_abs={max_abs}, rel_l2={rel_l2}")

    print("KERNEL_OK")
</pallas_src>

<mosaic_0001>
module attributes {stable_mosaic.version = 11 : i64} {
  func.func @_conv1x1_stats_kernel(%arg0: i32, %arg1: memref<512x128xbf16, #tpu.memory_space<vmem>>, %arg2: memref<128x128xbf16, #tpu.memory_space<vmem>>, %arg3: memref<512x128xbf16, #tpu.memory_space<vmem>>, %arg4: memref<1x1x128xf32, #tpu.memory_space<vmem>>, %arg5: memref<1x1x128xf32, #tpu.memory_space<vmem>>) attributes {dimension_semantics = [#tpu.dimension_semantics<parallel>], iteration_bounds = array<i64: 1>, scalar_prefetch = 0 : i64, scratch_operands = 0 : i64, tpu.core_type = #tpu.core_type<tc>, window_params = [{transform_indices = @transform_0, window_bounds = array<i64: 512, 128>}, {pipeline_mode = #tpu.pipeline_mode<synchronous>, transform_indices = @transform_1, window_bounds = array<i64: 128, 128>}, {transform_indices = @transform_2, window_bounds = array<i64: 512, 128>}, {transform_indices = @transform_3, window_bounds = array<i64: 1, 1, 128>}, {transform_indices = @transform_4, window_bounds = array<i64: 1, 1, 128>}]} {
    %c0 = arith.constant 0 : index
    %c0_0 = arith.constant 0 : index
    %0 = vector.load %arg1[%c0, %c0_0] : memref<512x128xbf16, #tpu.memory_space<vmem>>, vector<512x128xbf16>
    %c0_1 = arith.constant 0 : index
    %c0_2 = arith.constant 0 : index
    %1 = vector.load %arg2[%c0_1, %c0_2] : memref<128x128xbf16, #tpu.memory_space<vmem>>, vector<128x128xbf16>
    %cst = arith.constant dense<0.000000e+00> : vector<512x128xf32>
    %2 = tpu.matmul %0, %1, %cst {dimension_numbers = #tpu.dot_dimension_numbers<[1], [0], [0], [1], [0, 0, 1, 1], [], []>} : vector<512x128xbf16>, vector<128x128xbf16>, vector<512x128xf32> -> vector<512x128xf32>
    %cst_3 = arith.constant dense<0.000000e+00> : vector<128xf32>
    %3 = vector.multi_reduction <add>, %2, %cst_3 [0] : vector<512x128xf32> to vector<128xf32>
    %4 = vector.shape_cast %3 : vector<128xf32> to vector<1x128xf32>
    %5 = vector.shape_cast %4 : vector<1x128xf32> to vector<1x1x128xf32>
    %c0_4 = arith.constant 0 : index
    %c0_5 = arith.constant 0 : index
    %c0_6 = arith.constant 0 : index
    %6 = vector.load %arg4[%c0_4, %c0_5, %c0_6] : memref<1x1x128xf32, #tpu.memory_space<vmem>>, vector<1x1x128xf32>
    tpu.vector_store %arg4[%c0_4, %c0_5, %c0_6], %5 {strides = array<i32>} : memref<1x1x128xf32, #tpu.memory_space<vmem>>, vector<1x1x128xf32>,
    %7 = arith.mulf %2, %2 : vector<512x128xf32>
    %cst_7 = arith.constant dense<0.000000e+00> : vector<128xf32>
    %8 = vector.multi_reduction <add>, %7, %cst_7 [0] : vector<512x128xf32> to vector<128xf32>
    %9 = vector.shape_cast %8 : vector<128xf32> to vector<1x128xf32>
    %10 = vector.shape_cast %9 : vector<1x128xf32> to vector<1x1x128xf32>
    %c0_8 = arith.constant 0 : index
    %c0_9 = arith.constant 0 : index
    %c0_10 = arith.constant 0 : index
    %11 = vector.load %arg5[%c0_8, %c0_9, %c0_10] : memref<1x1x128xf32, #tpu.memory_space<vmem>>, vector<1x1x128xf32>
    tpu.vector_store %arg5[%c0_8, %c0_9, %c0_10], %10 {strides = array<i32>} : memref<1x1x128xf32, #tpu.memory_space<vmem>>, vector<1x1x128xf32>,
    %12 = arith.truncf %2 : vector<512x128xf32> to vector<512x128xbf16>
    %c0_11 = arith.constant 0 : index
    %c0_12 = arith.constant 0 : index
    %13 = vector.load %arg3[%c0_11, %c0_12] : memref<512x128xbf16, #tpu.memory_space<vmem>>, vector<512x128xbf16>
    tpu.vector_store %arg3[%c0_11, %c0_12], %12 {strides = array<i32>} : memref<512x128xbf16, #tpu.memory_space<vmem>>, vector<512x128xbf16>,
    return
  }
  func.func @transform_0(%arg0: i32) -> (i32, i32) {
    %c0_i32 = arith.constant 0 : i32
    %c0_i32_0 = arith.constant 0 : i32
    return %arg0, %c0_i32 : i32, i32
  }
  func.func @transform_1(%arg0: i32) -> (i32, i32) {
    %c0_i32 = arith.constant 0 : i32
    %c0_i32_0 = arith.constant 0 : i32
    %c0_i32_1 = arith.constant 0 : i32
    return %c0_i32, %c0_i32_0 : i32, i32
  }
  func.func @transform_2(%arg0: i32) -> (i32, i32) {
    %c0_i32 = arith.constant 0 : i32
    %c0_i32_0 = arith.constant 0 : i32
    return %arg0, %c0_i32 : i32, i32
  }
  func.func @transform_3(%arg0: i32) -> (i32, i32, i32) {
    %c0_i32 = arith.constant 0 : i32
    %c0_i32_0 = arith.constant 0 : i32
    %c0_i32_1 = arith.constant 0 : i32
    return %arg0, %c0_i32, %c0_i32_0 : i32, i32, i32
  }
  func.func @transform_4(%arg0: i32) -> (i32, i32, i32) {
    %c0_i32 = arith.constant 0 : i32
    %c0_i32_0 = arith.constant 0 : i32
    %c0_i32_1 = arith.constant 0 : i32
    return %arg0, %c0_i32, %c0_i32_0 : i32, i32, i32
  }
}

</mosaic_0001>

<bundles_post_ra>
// kernel: tpu_custom_call.1
= control target key start
LH: loop header
LB: loop body
LE: loop exit
PB: predicated region body
PF: predicated region fallthrough
CT: control target
= control target key end

     0   :  { %10 = vsyncpa [#allocation3], 0  ;;  %s2184_s0 = inlined_call_operand.hbm [shape: bf16[512,128], index: 0, kind: input, shape index: {}]   ;;  %s2185_s1 = inlined_call_operand.hbm [shape: bf16[128,128], index: 1, kind: input, shape index: {}]   ;;  %s2186_s2 = inlined_call_operand.hbm [shape: bf16[512,128], index: 2, kind: output, shape index: {0}]   ;;  %s2187_s3 = inlined_call_operand.hbm [shape: f32[1,1,128], index: 3, kind: output, shape index: {1}]   ;;  %s2188_s4 = inlined_call_operand.hbm [shape: f32[1,1,128], index: 4, kind: output, shape index: {2}]  }
   0x1   :  { %11 = vsyncpa [#allocation6], 0 }
   0x2   :  { %12 = vsyncpa [#allocation4], 0 }
   0x3   :  { %13 = vsyncpa [#allocation9], 0  ;;  %s1883_s15 = smov [#allocation2]   ;;  %s1765_s19 = scalar_lea.hbm %s2184_s0, 4096 }
   0x4   :  { %s19_s16 = sshll.u32 %s1883_s15, 4  ;;  %p1766_p0 = scmp.ne.s32.totalorder %s2184_s0, %s1765_s19  ;;  %s20_s16 = int_to_ptr.vmem [resolvable:$true] %s19_s16 }
   0x5   :  { %p1769_p1 = scmp.lt.u32.totalorder %s1765_s19, %s2184_s0 }
   0x7   :  { %p1771_p2 = pnand %p1769_p1, %p1766_p0 }
   0x9   :  { %1774 = shalt.err (!%p1771_p2)
}
   0xa   :  { %s1775_s24 = scalar_lea.vmem %s20_s16, 4096  ;;  %p1780_p4 = scmp.lt.s32.totalorder %s20_s16, %s20_s16 }
   0xb   :  { %p1776_p3 = scmp.ne.s32.totalorder %s20_s16, %s1775_s24  ;;  %p1781_p5 = scmp.lt.s32.totalorder %s1775_s24, %s1775_s24 }
   0xd   :  { %p1782_p6 = por %p1781_p5, %p1780_p4 }
   0xf   :  { %p1783_p7 = pnand %p1782_p6, %p1776_p3 }
  0x11   :  { %1786 = shalt.err (!%p1783_p7)
}
  0x12   :  { %s1884_s25 = smov 64   ;;  %s1885_s26 = smov 4  }
  0x13   :  { %25 = dma.hbm_to_vmem [thread:$0]  %s2184_s0, 4096, %s20_s16, [#allocation3], %s1884_s25, %s1884_s25, %s1885_s26  }
  0x14   :  { %s1886_s29 = smov [#allocation5]   ;;  %s1787_s7 = scalar_lea.hbm %s2185_s1, 1024 }
  0x15   :  { %s31_s30 = sshll.u32 %s1886_s29, 4  ;;  %p1788_p8 = scmp.ne.s32.totalorder %s2185_s1, %s1787_s7  ;;  %s32_s30 = int_to_ptr.vmem [resolvable:$true] %s31_s30 }
  0x16   :  { %p1791_p9 = scmp.lt.u32.totalorder %s1787_s7, %s2185_s1 }
  0x18   :  { %p1793_p10 = pnand %p1791_p9, %p1788_p8 }
  0x1a   :  { %1796 = shalt.err (!%p1793_p10)
}
  0x1b   :  { %s1797_s12 = scalar_lea.vmem %s32_s30, 1024  ;;  %p1802_p12 = scmp.lt.s32.totalorder %s32_s30, %s32_s30 }
  0x1c   :  { %p1798_p11 = scmp.ne.s32.totalorder %s32_s30, %s1797_s12  ;;  %p1803_p13 = scmp.lt.s32.totalorder %s1797_s12, %s1797_s12 }
  0x1e   :  { %p1804_p0 = por %p1803_p13, %p1802_p12 }
  0x20   :  { %p1805_p1 = pnand %p1804_p0, %p1798_p11 }
  0x22   :  { %1808 = shalt.err (!%p1805_p1)
}
  0x23   :  { %37 = dma.hbm_to_vmem [thread:$0]  %s2185_s1, 1024, %s32_s30, [#allocation6], %s1884_s25, %s1884_s25, %s1885_s26  }
  0x24   :  { %1875 = dma.done.wait [#allocation3], 4096  }
  0x25   :  { %1876 = vsyncadd [#allocation3], 4294963200 }
  0x26   :  { %1877 = dma.done.wait [#allocation6], 1024  }
  0x27   :  { %1878 = vsyncadd [#allocation6], 4294966272  ;;  %v1725_v0 = vld [vmem:[#allocation5] sm:$0xff]   ;;  %v1726_v1 = vld [vmem:[#allocation5 + $0x8] sm:$0xff]   ;;  %s1887_s1 = smov [#allocation7]  }
  0x28   :  { %1622 = vmatprep.subr.bf16.mxu0 %v1725_v0  ;;  %1702 = vmatprep.subr.bf16.mxu1 %v1725_v0  ;;  %v1727_v2 = vld [vmem:[#allocation5 + $0x10] sm:$0xff]   ;;  %v1728_v3 = vld [vmem:[#allocation5 + $0x18] sm:$0xff]   ;;  %v1733_v4 = vld [vmem:[#allocation2] sm:$0xff]   ;;  %s1183_s14 = sshll.u32 %s1887_s1, 4  ;;  %s1184_s14 = int_to_ptr.vmem [resolvable:$true] %s1183_s14 }
  0x29   :  { %1623 = vmatpush3.bf16.msra.mxu0 %v1725_v0  ;;  %1710 = vmatpush3.bf16.msra.mxu1 %v1725_v0  ;;  %v1729_v5 = vld [vmem:[#allocation5 + $0x20] sm:$0xff]   ;;  %v1730_v6 = vld [vmem:[#allocation5 + $0x28] sm:$0xff]   ;;  %v1731_v7 = vld [vmem:[#allocation5 + $0x30] sm:$0xff]   ;;  %s1809_s15 = scalar_lea.vmem %s1184_s14, 4096  ;;  %p1814_p3 = scmp.lt.s32.totalorder %s1184_s14, %s1184_s14 }
  0x2a   :  { %1624 = vmatprep.subr.bf16.mxu0 %v1726_v1  ;;  %1703 = vmatprep.subr.bf16.mxu1 %v1726_v1  ;;  %v1732_v8 = vld [vmem:[#allocation5 + $0x38] sm:$0xff]   ;;  %v1749_v9 = vld [vmem:[#allocation2 + $0x80] sm:$0xff]   ;;  %v1734_v10 = vld [vmem:[#allocation2 + $0x8] sm:$0xff]   ;;  %p1810_p2 = scmp.ne.s32.totalorder %s1184_s14, %s1809_s15  ;;  %p1815_p4 = scmp.lt.s32.totalorder %s1809_s15, %s1809_s15 }
  0x2b   :  { %1638 = vmatprep.mubr.bf16.mxu0 %v1733_v4  ;;  %1670 = vmatprep.mubr.bf16.mxu1 %v1749_v9  ;;  %v1735_v11 = vld [vmem:[#allocation2 + $0x10] sm:$0xff]   ;;  %v1750_v12 = vld [vmem:[#allocation2 + $0x88] sm:$0xff]   ;;  %v1736_v14 = vld [vmem:[#allocation2 + $0x18] sm:$0xff]  }
  0x2c   :  { %v1751_v13 = vld [vmem:[#allocation2 + $0x90] sm:$0xff]   ;;  %v1737_v15 = vld [vmem:[#allocation2 + $0x20] sm:$0xff]   ;;  %v1752_v16 = vld [vmem:[#allocation2 + $0x98] sm:$0xff]   ;;  %p1816_p5 = por %p1815_p4, %p1814_p3 }
  0x2d   :  { %1625 = vmatpush3.bf16.msra.mxu0 %v1726_v1  ;;  %1711 = vmatpush3.bf16.msra.mxu1 %v1726_v1  ;;  %v1753_v17 = vld [vmem:[#allocation2 + $0xa0] sm:$0xff]   ;;  %v1738_v18 = vld [vmem:[#allocation2 + $0x28] sm:$0xff]   ;;  %v1739_v20 = vld [vmem:[#allocation2 + $0x30] sm:$0xff]  }
  0x2e   :  { %1626 = vmatprep.subr.bf16.mxu0 %v1727_v2  ;;  %1704 = vmatprep.subr.bf16.mxu1 %v1727_v2  ;;  %v1754_v19 = vld [vmem:[#allocation2 + $0xa8] sm:$0xff]   ;;  %v1755_v21 = vld [vmem:[#allocation2 + $0xb0] sm:$0xff]   ;;  %v1740_v22 = vld [vmem:[#allocation2 + $0x38] sm:$0xff]   ;;  %p1817_p6 = pnand %p1816_p5, %p1810_p2 }
  0x2f   :  { %v1756_v23 = vld [vmem:[#allocation2 + $0xb8] sm:$0xff]   ;;  %v1741_v24 = vld [vmem:[#allocation2 + $0x40] sm:$0xff]   ;;  %v1742_v26 = vld [vmem:[#allocation2 + $0x48] sm:$0xff]  }
  0x30   :  { %v1757_v25 = vld [vmem:[#allocation2 + $0xc0] sm:$0xff]   ;;  %v1758_v27 = vld [vmem:[#allocation2 + $0xc8] sm:$0xff]   ;;  %v1743_v28 = vld [vmem:[#allocation2 + $0x50] sm:$0xff]  }
  0x31   :  { %1627 = vmatpush3.bf16.msra.mxu0 %v1727_v2  ;;  %1712 = vmatpush3.bf16.msra.mxu1 %v1727_v2  ;;  %v1759_v29 = vld [vmem:[#allocation2 + $0xd0] sm:$0xff]   ;;  %v1744_v30 = vld [vmem:[#allocation2 + $0x58] sm:$0xff]   ;;  %v1745_v32 = vld [vmem:[#allocation2 + $0x60] sm:$0xff]  }
  0x32   :  { %1628 = vmatprep.subr.bf16.mxu0 %v1728_v3  ;;  %1705 = vmatprep.subr.bf16.mxu1 %v1728_v3  ;;  %v1760_v31 = vld [vmem:[#allocation2 + $0xd8] sm:$0xff]   ;;  %v1761_v33 = vld [vmem:[#allocation2 + $0xe0] sm:$0xff]   ;;  %v1746_v34 = vld [vmem:[#allocation2 + $0x68] sm:$0xff]  }
  0x33   :  { %v1762_v35 = vld [vmem:[#allocation2 + $0xe8] sm:$0xff]   ;;  %v1747_v36 = vld [vmem:[#allocation2 + $0x70] sm:$0xff]   ;;  %v1748_v38 = vld [vmem:[#allocation2 + $0x78] sm:$0xff]  }
  0x34   :  { %v1763_v37 = vld [vmem:[#allocation2 + $0xf0] sm:$0xff]   ;;  %v1764_v39 = vld [vmem:[#allocation2 + $0xf8] sm:$0xff]  }
  0x35   :  { %1629 = vmatpush3.bf16.msra.mxu0 %v1728_v3  ;;  %1713 = vmatpush3.bf16.msra.mxu1 %v1728_v3 }
  0x36   :  { %1630 = vmatprep.subr.bf16.mxu0 %v1729_v5  ;;  %1706 = vmatprep.subr.bf16.mxu1 %v1729_v5 }
  0x39   :  { %1631 = vmatpush3.bf16.msra.mxu0 %v1729_v5  ;;  %1714 = vmatpush3.bf16.msra.mxu1 %v1729_v5 }
  0x3a   :  { %1632 = vmatprep.subr.bf16.mxu0 %v1730_v6  ;;  %1707 = vmatprep.subr.bf16.mxu1 %v1730_v6 }
  0x3d   :  { %1633 = vmatpush3.bf16.msra.mxu0 %v1730_v6  ;;  %1715 = vmatpush3.bf16.msra.mxu1 %v1730_v6 }
  0x3e   :  { %1634 = vmatprep.subr.bf16.mxu0 %v1731_v7  ;;  %1708 = vmatprep.subr.bf16.mxu1 %v1731_v7 }
  0x41   :  { %1635 = vmatpush3.bf16.msra.mxu0 %v1731_v7  ;;  %1716 = vmatpush3.bf16.msra.mxu1 %v1731_v7 }
  0x42   :  { %1636 = vmatprep.subr.bf16.mxu0 %v1732_v8  ;;  %1709 = vmatprep.subr.bf16.mxu1 %v1732_v8 }
  0x45   :  { %1637 = vmatpush3.bf16.msra.mxu0 %v1732_v8  ;;  %1717 = vmatpush3.bf16.msra.mxu1 %v1732_v8 }
  0x48   :  { %1639 = vmatmul.mubr.bf16.vlgmr.msra.gmra.mrb[0].mxu0 %v1734_v10  ;;  %1671 = vmatmul.mubr.bf16.vlgmr.msra.gmra.mrb[0].mxu1 %v1750_v12 }
  0x49   :  { %1642 = vmatprep.mubr.bf16.mxu0 %v1735_v11  ;;  %1674 = vmatprep.mubr.bf16.mxu1 %v1751_v13 }
  0x50   :  { %1643 = vmatmul.mubr.bf16.gmra.mrb[4].mxu0 %v1736_v14  ;;  %1675 = vmatmul.mubr.bf16.gmra.mrb[4].mxu1 %v1752_v16 }
  0x51   :  { %1646 = vmatprep.mubr.bf16.mxu0 %v1737_v15  ;;  %1678 = vmatprep.mubr.bf16.mxu1 %v1753_v17 }
  0x58   :  { %1647 = vmatmul.mubr.bf16.gmra.mrb[8].mxu0 %v1738_v18  ;;  %1679 = vmatmul.mubr.bf16.gmra.mrb[8].mxu1 %v1754_v19 }
  0x59   :  { %1650 = vmatprep.mubr.bf16.mxu0 %v1739_v20  ;;  %1682 = vmatprep.mubr.bf16.mxu1 %v1755_v21 }
  0x60   :  { %1651 = vmatmul.mubr.bf16.gmra.mrb[12].mxu0 %v1740_v22  ;;  %1683 = vmatmul.mubr.bf16.gmra.mrb[12].mxu1 %v1756_v23 }
  0x61   :  { %1654 = vmatprep.mubr.bf16.mxu0 %v1741_v24  ;;  %1686 = vmatprep.mubr.bf16.mxu1 %v1757_v25 }
  0x68   :  { %1655 = vmatmul.mubr.bf16.gmra.mrb[16].mxu0 %v1742_v26  ;;  %1687 = vmatmul.mubr.bf16.gmra.mrb[16].mxu1 %v1758_v27 }
  0x69   :  { %1658 = vmatprep.mubr.bf16.mxu0 %v1743_v28  ;;  %1690 = vmatprep.mubr.bf16.mxu1 %v1759_v29 }
  0x70   :  { %1659 = vmatmul.mubr.bf16.gmra.mrb[20].mxu0 %v1744_v30  ;;  %1691 = vmatmul.mubr.bf16.gmra.mrb[20].mxu1 %v1760_v31 }
  0x71   :  { %1662 = vmatprep.mubr.bf16.mxu0 %v1745_v32  ;;  %1694 = vmatprep.mubr.bf16.mxu1 %v1761_v33 }
  0x78   :  { %1663 = vmatmul.mubr.bf16.gmra.mrb[24].mxu0 %v1746_v34  ;;  %1695 = vmatmul.mubr.bf16.gmra.mrb[24].mxu1 %v1762_v35 }
  0x79   :  { %1666 = vmatprep.mubr.bf16.mxu0 %v1747_v36  ;;  %1698 = vmatprep.mubr.bf16.mxu1 %v1763_v37 }
  0x80   :  { %1667 = vmatmul.mubr.bf16.gmra.mrb[28].mxu0 %v1748_v38  ;;  %1699 = vmatmul.mubr.bf16.gmra.mrb[28].mxu1 %v1764_v39 }
 0x11b   :  { %v1640_v40 = vpop.f32.mrb[0].mxu0  ;;  %v1945_v41 = vpop.f32.mrb[0].mxu1 }
 0x11c   :  { %v399_v42 = vpop.f32.mrb[1].mxu0  ;;  %v1947_v43 = vpop.f32.mrb[1].mxu1  ;;  %v726_v55 = vmul.f32 %v1640_v40, %v1640_v40 }
 0x11d   :  { %v1641_v44 = vpop.f32.mrb[2].mxu0  ;;  %v1949_v45 = vpop.f32.mrb[2].mxu1  ;;  %v724_v50 = vmul.f32 %v399_v42, %v399_v42 }
 0x11e   :  { %v1399_v46 = vpack.c.bf16 %v1641_v44, %v1640_v40  ;;  %v402_v47 = vpop.f32.mrb[3].mxu0  ;;  %v1479_v48 = vpack.c.bf16 %v1949_v45, %v1945_v41  ;;  %v1953_v49 = vpop.f32.mrb[3].mxu1  ;;  %v727_v58 = vmul.f32 %v1641_v44, %v1641_v44 }
 0x11f   :  { %v654_v51 = vadd.f32 %v402_v47, %v399_v42  ;;  %v725_v52 = vmul.f32 %v402_v47, %v402_v47  ;;  %v1394_v53 = vpack.c.bf16 %v402_v47, %v399_v42  ;;  %v1474_v54 = vpack.c.bf16 %v1953_v49, %v1947_v43 }
 0x120   :  { %1551 = vst [vmem:[#allocation7 + $0x8] sm:$0xff] %v1399_v46   ;;  %1567 = vst [vmem:[#allocation7 + $0x88] sm:$0xff] %v1479_v48  }
 0x121   :  { %v655_v56 = vadd.f32 %v1640_v40, %v654_v51  ;;  %v788_v57 = vadd.f32 %v725_v52, %v724_v50  ;;  %1395 = vst [vmem:[#allocation7] sm:$0xff] %v1394_v53   ;;  %1566 = vst [vmem:[#allocation7 + $0x80] sm:$0xff] %v1474_v54  }
 0x123   :  { %v789_v59 = vadd.f32 %v788_v57, %v726_v55  ;;  %v1644_v60 = vpop.f32.mrb[4].mxu0  ;;  %v656_v61 = vadd.f32 %v1641_v44, %v655_v56  ;;  %v1957_v62 = vpop.f32.mrb[4].mxu1 }
 0x124   :  { %v415_v63 = vpop.f32.mrb[5].mxu0  ;;  %v1959_v0 = vpop.f32.mrb[5].mxu1  ;;  %v730_v15 = vmul.f32 %v1644_v60, %v1644_v60 }
 0x125   :  { %v657_v1 = vadd.f32 %v656_v61, %v415_v63  ;;  %v728_v2 = vmul.f32 %v415_v63, %v415_v63  ;;  %v790_v3 = vadd.f32 %v789_v59, %v727_v58  ;;  %v1645_v4 = vpop.f32.mrb[6].mxu0  ;;  %v1961_v5 = vpop.f32.mrb[6].mxu1 }
 0x126   :  { %v1409_v6 = vpack.c.bf16 %v1645_v4, %v1644_v60  ;;  %v418_v7 = vpop.f32.mrb[7].mxu0  ;;  %v1489_v8 = vpack.c.bf16 %v1961_v5, %v1957_v62  ;;  %v1965_v9 = vpop.f32.mrb[7].mxu1  ;;  %v731_v18 = vmul.f32 %v1645_v4, %v1645_v4 }
 0x127   :  { %v791_v10 = vadd.f32 %v790_v3, %v728_v2  ;;  %v658_v11 = vadd.f32 %v657_v1, %v418_v7  ;;  %v729_v12 = vmul.f32 %v418_v7, %v418_v7  ;;  %v1404_v13 = vpack.c.bf16 %v418_v7, %v415_v63 }
 0x128   :  { %1553 = vst [vmem:[#allocation7 + $0x18] sm:$0xff] %v1409_v6   ;;  %1569 = vst [vmem:[#allocation7 + $0x98] sm:$0xff] %v1489_v8   ;;  %v1484_v14 = vpack.c.bf16 %v1965_v9, %v1959_v0 }
 0x129   :  { %v659_v16 = vadd.f32 %v1644_v60, %v658_v11  ;;  %v792_v17 = vadd.f32 %v791_v10, %v729_v12  ;;  %1552 = vst [vmem:[#allocation7 + $0x10] sm:$0xff] %v1404_v13  }
 0x12a   :  { %1568 = vst [vmem:[#allocation7 + $0x90] sm:$0xff] %v1484_v14  }
 0x12b   :  { %v793_v19 = vadd.f32 %v792_v17, %v730_v15  ;;  %v1648_v20 = vpop.f32.mrb[8].mxu0  ;;  %v660_v21 = vadd.f32 %v1645_v4, %v659_v16  ;;  %v1969_v22 = vpop.f32.mrb[8].mxu1 }
 0x12c   :  { %v431_v23 = vpop.f32.mrb[9].mxu0  ;;  %v1971_v24 = vpop.f32.mrb[9].mxu1  ;;  %v734_v39 = vmul.f32 %v1648_v20, %v1648_v20 }
 0x12d   :  { %v661_v25 = vadd.f32 %v660_v21, %v431_v23  ;;  %v732_v26 = vmul.f32 %v431_v23, %v431_v23  ;;  %v794_v27 = vadd.f32 %v793_v19, %v731_v18  ;;  %v1649_v28 = vpop.f32.mrb[10].mxu0  ;;  %v1973_v29 = vpop.f32.mrb[10].mxu1 }
 0x12e   :  { %v1419_v30 = vpack.c.bf16 %v1649_v28, %v1648_v20  ;;  %v434_v31 = vpop.f32.mrb[11].mxu0  ;;  %v1499_v32 = vpack.c.bf16 %v1973_v29, %v1969_v22  ;;  %v1977_v33 = vpop.f32.mrb[11].mxu1  ;;  %v735_v44 = vmul.f32 %v1649_v28, %v1649_v28 }
 0x12f   :  { %v795_v34 = vadd.f32 %v794_v27, %v732_v26  ;;  %v662_v35 = vadd.f32 %v661_v25, %v434_v31  ;;  %v733_v36 = vmul.f32 %v434_v31, %v434_v31  ;;  %v1414_v37 = vpack.c.bf16 %v434_v31, %v431_v23 }
 0x130   :  { %1555 = vst [vmem:[#allocation7 + $0x28] sm:$0xff] %v1419_v30   ;;  %1571 = vst [vmem:[#allocation7 + $0xa8] sm:$0xff] %v1499_v32   ;;  %v1494_v38 = vpack.c.bf16 %v1977_v33, %v1971_v24 }
 0x131   :  { %v663_v40 = vadd.f32 %v1648_v20, %v662_v35  ;;  %v796_v42 = vadd.f32 %v795_v34, %v733_v36  ;;  %1554 = vst [vmem:[#allocation7 + $0x20] sm:$0xff] %v1414_v37  }
 0x132   :  { %1570 = vst [vmem:[#allocation7 + $0xa0] sm:$0xff] %v1494_v38  }
 0x133   :  { %v797_v46 = vadd.f32 %v796_v42, %v734_v39  ;;  %v1652_v47 = vpop.f32.mrb[12].mxu0  ;;  %v664_v48 = vadd.f32 %v1649_v28, %v663_v40  ;;  %v1981_v50 = vpop.f32.mrb[12].mxu1 }
 0x134   :  { %v447_v51 = vpop.f32.mrb[13].mxu0  ;;  %v1983_v52 = vpop.f32.mrb[13].mxu1  ;;  %v738_v6 = vmul.f32 %v1652_v47, %v1652_v47 }
 0x135   :  { %v665_v53 = vadd.f32 %v664_v48, %v447_v51  ;;  %v736_v54 = vmul.f32 %v447_v51, %v447_v51  ;;  %v798_v55 = vadd.f32 %v797_v46, %v735_v44  ;;  %v1653_v56 = vpop.f32.mrb[14].mxu0  ;;  %v1985_v57 = vpop.f32.mrb[14].mxu1 }
 0x136   :  { %v1429_v58 = vpack.c.bf16 %v1653_v56, %v1652_v47  ;;  %v450_v59 = vpop.f32.mrb[15].mxu0  ;;  %v1509_v60 = vpack.c.bf16 %v1985_v57, %v1981_v50  ;;  %v1989_v61 = vpop.f32.mrb[15].mxu1  ;;  %v739_v10 = vmul.f32 %v1653_v56, %v1653_v56 }
 0x137   :  { %v799_v63 = vadd.f32 %v798_v55, %v736_v54  ;;  %v666_v1 = vadd.f32 %v665_v53, %v450_v59  ;;  %v737_v2 = vmul.f32 %v450_v59, %v450_v59  ;;  %v1424_v3 = vpack.c.bf16 %v450_v59, %v447_v51 }
 0x138   :  { %1557 = vst [vmem:[#allocation7 + $0x38] sm:$0xff] %v1429_v58   ;;  %1573 = vst [vmem:[#allocation7 + $0xb8] sm:$0xff] %v1509_v60   ;;  %v1504_v4 = vpack.c.bf16 %v1989_v61, %v1983_v52 }
 0x139   :  { %v667_v7 = vadd.f32 %v1652_v47, %v666_v1  ;;  %v800_v8 = vadd.f32 %v799_v63, %v737_v2  ;;  %1556 = vst [vmem:[#allocation7 + $0x30] sm:$0xff] %v1424_v3  }
 0x13a   :  { %1572 = vst [vmem:[#allocation7 + $0xb0] sm:$0xff] %v1504_v4  }
 0x13b   :  { %v801_v11 = vadd.f32 %v800_v8, %v738_v6  ;;  %v1656_v12 = vpop.f32.mrb[16].mxu0  ;;  %v668_v13 = vadd.f32 %v1653_v56, %v667_v7  ;;  %v1993_v14 = vpop.f32.mrb[16].mxu1 }
 0x13c   :  { %v463_v15 = vpop.f32.mrb[17].mxu0  ;;  %v1995_v16 = vpop.f32.mrb[17].mxu1  ;;  %v742_v35 = vmul.f32 %v1656_v12, %v1656_v12 }
 0x13d   :  { %v669_v17 = vadd.f32 %v668_v13, %v463_v15  ;;  %v740_v18 = vmul.f32 %v463_v15, %v463_v15  ;;  %v802_v19 = vadd.f32 %v801_v11, %v739_v10  ;;  %v1657_v20 = vpop.f32.mrb[18].mxu0  ;;  %v1997_v21 = vpop.f32.mrb[18].mxu1 }
 0x13e   :  { %v1439_v23 = vpack.c.bf16 %v1657_v20, %v1656_v12  ;;  %v466_v25 = vpop.f32.mrb[19].mxu0  ;;  %v1519_v26 = vpack.c.bf16 %v1997_v21, %v1993_v14  ;;  %v2001_v27 = vpop.f32.mrb[19].mxu1  ;;  %v743_v38 = vmul.f32 %v1657_v20, %v1657_v20 }
 0x13f   :  { %v803_v28 = vadd.f32 %v802_v19, %v740_v18  ;;  %v670_v30 = vadd.f32 %v669_v17, %v466_v25  ;;  %v741_v31 = vmul.f32 %v466_v25, %v466_v25  ;;  %v1434_v32 = vpack.c.bf16 %v466_v25, %v463_v15 }
 0x140   :  { %1559 = vst [vmem:[#allocation7 + $0x48] sm:$0xff] %v1439_v23   ;;  %1575 = vst [vmem:[#allocation7 + $0xc8] sm:$0xff] %v1519_v26   ;;  %v1514_v34 = vpack.c.bf16 %v2001_v27, %v1995_v16 }
 0x141   :  { %v671_v36 = vadd.f32 %v1656_v12, %v670_v30  ;;  %v804_v37 = vadd.f32 %v803_v28, %v741_v31  ;;  %1558 = vst [vmem:[#allocation7 + $0x40] sm:$0xff] %v1434_v32  }
 0x142   :  { %1574 = vst [vmem:[#allocation7 + $0xc0] sm:$0xff] %v1514_v34  }
 0x143   :  { %v805_v39 = vadd.f32 %v804_v37, %v742_v35  ;;  %v1660_v40 = vpop.f32.mrb[20].mxu0  ;;  %v672_v42 = vadd.f32 %v1657_v20, %v671_v36  ;;  %v2005_v44 = vpop.f32.mrb[20].mxu1 }
 0x144   :  { %v479_v46 = vpop.f32.mrb[21].mxu0  ;;  %v2007_v47 = vpop.f32.mrb[21].mxu1  ;;  %v746_v6 = vmul.f32 %v1660_v40, %v1660_v40 }
 0x145   :  { %v673_v48 = vadd.f32 %v672_v42, %v479_v46  ;;  %v744_v51 = vmul.f32 %v479_v46, %v479_v46  ;;  %v806_v53 = vadd.f32 %v805_v39, %v743_v38  ;;  %v1661_v54 = vpop.f32.mrb[22].mxu0  ;;  %v2009_v55 = vpop.f32.mrb[22].mxu1 }
 0x146   :  { %v1449_v56 = vpack.c.bf16 %v1661_v54, %v1660_v40  ;;  %v482_v58 = vpop.f32.mrb[23].mxu0  ;;  %v1529_v59 = vpack.c.bf16 %v2009_v55, %v2005_v44  ;;  %v2013_v60 = vpop.f32.mrb[23].mxu1  ;;  %v747_v10 = vmul.f32 %v1661_v54, %v1661_v54 }
 0x147   :  { %v807_v63 = vadd.f32 %v806_v53, %v744_v51  ;;  %v674_v1 = vadd.f32 %v673_v48, %v482_v58  ;;  %v745_v2 = vmul.f32 %v482_v58, %v482_v58  ;;  %v1444_v3 = vpack.c.bf16 %v482_v58, %v479_v46 }
 0x148   :  { %1561 = vst [vmem:[#allocation7 + $0x58] sm:$0xff] %v1449_v56   ;;  %1577 = vst [vmem:[#allocation7 + $0xd8] sm:$0xff] %v1529_v59   ;;  %v1524_v4 = vpack.c.bf16 %v2013_v60, %v2007_v47 }
 0x149   :  { %v675_v7 = vadd.f32 %v1660_v40, %v674_v1  ;;  %v808_v8 = vadd.f32 %v807_v63, %v745_v2  ;;  %1560 = vst [vmem:[#allocation7 + $0x50] sm:$0xff] %v1444_v3  }
 0x14a   :  { %1576 = vst [vmem:[#allocation7 + $0xd0] sm:$0xff] %v1524_v4  }
 0x14b   :  { %v809_v11 = vadd.f32 %v808_v8, %v746_v6  ;;  %v1664_v12 = vpop.f32.mrb[24].mxu0  ;;  %v676_v13 = vadd.f32 %v1661_v54, %v675_v7  ;;  %v2017_v15 = vpop.f32.mrb[24].mxu1 }
 0x14c   :  { %v495_v17 = vpop.f32.mrb[25].mxu0  ;;  %v2019_v18 = vpop.f32.mrb[25].mxu1  ;;  %v750_v39 = vmul.f32 %v1664_v12, %v1664_v12 }
 0x14d   :  { %v677_v19 = vadd.f32 %v676_v13, %v495_v17  ;;  %v748_v20 = vmul.f32 %v495_v17, %v495_v17  ;;  %v810_v23 = vadd.f32 %v809_v11, %v747_v10  ;;  %v1665_v25 = vpop.f32.mrb[26].mxu0  ;;  %v2021_v26 = vpop.f32.mrb[26].mxu1 }
 0x14e   :  { %v1459_v28 = vpack.c.bf16 %v1665_v25, %v1664_v12  ;;  %v498_v30 = vpop.f32.mrb[27].mxu0  ;;  %v1539_v31 = vpack.c.bf16 %v2021_v26, %v2017_v15  ;;  %v2025_v32 = vpop.f32.mrb[27].mxu1  ;;  %v751_v46 = vmul.f32 %v1665_v25, %v1665_v25 }
 0x14f   :  { %v811_v34 = vadd.f32 %v810_v23, %v748_v20  ;;  %v678_v35 = vadd.f32 %v677_v19, %v498_v30  ;;  %v749_v36 = vmul.f32 %v498_v30, %v498_v30  ;;  %v1454_v37 = vpack.c.bf16 %v498_v30, %v495_v17 }
 0x150   :  { %1563 = vst [vmem:[#allocation7 + $0x68] sm:$0xff] %v1459_v28   ;;  %1579 = vst [vmem:[#allocation7 + $0xe8] sm:$0xff] %v1539_v31   ;;  %v1534_v38 = vpack.c.bf16 %v2025_v32, %v2019_v18  ;;  %v756_v31 = vmul.f32 %v1947_v43, %v1947_v43 }
 0x151   :  { %v679_v40 = vadd.f32 %v1664_v12, %v678_v35  ;;  %v812_v42 = vadd.f32 %v811_v34, %v749_v36  ;;  %1562 = vst [vmem:[#allocation7 + $0x60] sm:$0xff] %v1454_v37  }
 0x152   :  { %1578 = vst [vmem:[#allocation7 + $0xe0] sm:$0xff] %v1534_v38  }
 0x153   :  { %v813_v48 = vadd.f32 %v812_v42, %v750_v39  ;;  %v1668_v51 = vpop.f32.mrb[28].mxu0  ;;  %v680_v53 = vadd.f32 %v1665_v25, %v679_v40  ;;  %v2029_v54 = vpop.f32.mrb[28].mxu1 }
 0x154   :  { %v511_v56 = vpop.f32.mrb[29].mxu0  ;;  %v2031_v58 = vpop.f32.mrb[29].mxu1  ;;  %v754_v19 = vmul.f32 %v1668_v51, %v1668_v51 }
 0x155   :  { %v681_v59 = vadd.f32 %v680_v53, %v511_v56  ;;  %v752_v63 = vmul.f32 %v511_v56, %v511_v56  ;;  %v814_v1 = vadd.f32 %v813_v48, %v751_v46  ;;  %v1669_v2 = vpop.f32.mrb[30].mxu0  ;;  %v2033_v3 = vpop.f32.mrb[30].mxu1 }
 0x156   :  { %v1469_v4 = vpack.c.bf16 %v1669_v2, %v1668_v51  ;;  %v514_v6 = vpop.f32.mrb[31].mxu0  ;;  %v1549_v7 = vpack.c.bf16 %v2033_v3, %v2029_v54  ;;  %v2037_v8 = vpop.f32.mrb[31].mxu1  ;;  %v755_v25 = vmul.f32 %v1669_v2, %v1669_v2 }
 0x157   :  { %v815_v10 = vadd.f32 %v814_v1, %v752_v63  ;;  %v682_v11 = vadd.f32 %v681_v59, %v514_v6  ;;  %v753_v12 = vmul.f32 %v514_v6, %v514_v6  ;;  %v1464_v13 = vpack.c.bf16 %v514_v6, %v511_v56 }
 0x158   :  { %1565 = vst [vmem:[#allocation7 + $0x78] sm:$0xff] %v1469_v4   ;;  %1581 = vst [vmem:[#allocation7 + $0xf8] sm:$0xff] %v1549_v7   ;;  %v1544_v17 = vpack.c.bf16 %v2037_v8, %v2031_v58 }
 0x159   :  { %v683_v20 = vadd.f32 %v1668_v51, %v682_v11  ;;  %v816_v23 = vadd.f32 %v815_v10, %v753_v12  ;;  %1564 = vst [vmem:[#allocation7 + $0x70] sm:$0xff] %v1464_v13  }
 0x15a   :  { %1580 = vst [vmem:[#allocation7 + $0xf0] sm:$0xff] %v1544_v17  }
 0x15b   :  { %v817_v28 = vadd.f32 %v816_v23, %v754_v19  ;;  %v684_v30 = vadd.f32 %v1669_v2, %v683_v20 }
 0x15c   :  { %1820 = shalt.err (!%p1817_p6)
}
 0x15d   :  { %s1821_s18 = scalar_lea.hbm %s2186_s2, 4096 }
 0x15e   :  { %p1822_p7 = scmp.ne.s32.totalorder %s2186_s2, %s1821_s18  ;;  %p1825_p8 = scmp.lt.u32.totalorder %s1821_s18, %s2186_s2 }
 0x160   :  { %p1827_p9 = pnand %p1825_p8, %p1822_p7 }
 0x162   :  { %1830 = shalt.err (!%p1827_p9)
}
 0x163   :  { %1189 = dma.vmem_to_hbm [thread:$0]  %s1184_s14, 4096, %s2186_s2, [#allocation4], %s1884_s25, %s1884_s25, %s1885_s26   ;;  %v685_v34 = vadd.f32 %v684_v30, %v1947_v43  ;;  %v818_v35 = vadd.f32 %v817_v28, %v755_v25  ;;  %v757_v38 = vmul.f32 %v1953_v49, %v1953_v49  ;;  %v758_v39 = vmul.f32 %v1945_v41, %v1945_v41 }
 0x164   :  { %v759_v46 = vmul.f32 %v1949_v45, %v1949_v45  ;;  %v760_v43 = vmul.f32 %v1959_v0, %v1959_v0  ;;  %v761_v63 = vmul.f32 %v1965_v9, %v1965_v9  ;;  %v765_v12 = vmul.f32 %v1977_v33, %v1977_v33  ;;  %s1888_s2 = smov [#allocation8]   ;;  %s1889_s26 = smov [#allocation10]  }
 0x165   :  { %v819_v36 = vadd.f32 %v818_v35, %v756_v31  ;;  %v686_v37 = vadd.f32 %v685_v34, %v1953_v49  ;;  %v769_v30 = vmul.f32 %v1989_v61, %v1989_v61  ;;  %s1196_s25 = sshll.u32 %s1888_s2, 4  ;;  %s1206_s27 = sshll.u32 %s1889_s26, 4  ;;  %s1197_s25 = int_to_ptr.vmem [resolvable:$true] %s1196_s25  ;;  %s2152_s27 = int_to_ptr.vmem [resolvable:$true] %s1206_s27 }
 0x166   :  { %s1831_s28 = scalar_lea.vmem %s1197_s25, 16  ;;  %s1835_s29 = scalar_lea.vmem %s1197_s25, 32 }
 0x167   :  { %v687_v40 = vadd.f32 %v1945_v41, %v686_v37  ;;  %v820_v42 = vadd.f32 %v819_v36, %v757_v38  ;;  %v762_v41 = vmul.f32 %v1957_v62, %v1957_v62  ;;  %p1832_p10 = scmp.ne.s32.totalorder %s1197_s25, %s1831_s28  ;;  %p1836_p11 = scmp.lt.s32.totalorder %s1197_s25, %s1197_s25 }
 0x168   :  { %p1837_p12 = scmp.lt.s32.totalorder %s1835_s29, %s1831_s28 }
 0x169   :  { %v821_v48 = vadd.f32 %v820_v42, %v758_v39  ;;  %v688_v51 = vadd.f32 %v1949_v45, %v687_v40  ;;  %v763_v45 = vmul.f32 %v1961_v5, %v1961_v5  ;;  %v773_v40 = vmul.f32 %v2001_v27, %v2001_v27 }
 0x16a   :  { %p1838_p13 = por %p1837_p12, %p1836_p11 }
 0x16b   :  { %v689_v53 = vadd.f32 %v688_v51, %v1959_v0  ;;  %v822_v56 = vadd.f32 %v821_v48, %v759_v46  ;;  %v764_v0 = vmul.f32 %v1971_v24, %v1971_v24 }
 0x16c   :  { %p1839_p0 = pnand %p1838_p13, %p1832_p10 }
 0x16d   :  { %v823_v59 = vadd.f32 %v822_v56, %v760_v43  ;;  %v690_v49 = vadd.f32 %v689_v53, %v1965_v9 }
 0x16f   :  { %v691_v1 = vadd.f32 %v1957_v62, %v690_v49  ;;  %v824_v2 = vadd.f32 %v823_v59, %v761_v63  ;;  %v766_v62 = vmul.f32 %v1969_v22, %v1969_v22  ;;  %v777_v59 = vmul.f32 %v2013_v60, %v2013_v60 }
 0x171   :  { %v825_v4 = vadd.f32 %v824_v2, %v762_v41  ;;  %v692_v6 = vadd.f32 %v1961_v5, %v691_v1  ;;  %v767_v5 = vmul.f32 %v1973_v29, %v1973_v29 }
 0x173   :  { %v693_v7 = vadd.f32 %v692_v6, %v1971_v24  ;;  %v826_v10 = vadd.f32 %v825_v4, %v763_v45  ;;  %v768_v24 = vmul.f32 %v1983_v52, %v1983_v52  ;;  %v781_v6 = vmul.f32 %v2025_v32, %v2025_v32 }
 0x175   :  { %v827_v11 = vadd.f32 %v826_v10, %v764_v0  ;;  %v694_v9 = vadd.f32 %v693_v7, %v1977_v33 }
 0x177   :  { %v695_v13 = vadd.f32 %v1969_v22, %v694_v9  ;;  %v828_v17 = vadd.f32 %v827_v11, %v765_v12  ;;  %v770_v22 = vmul.f32 %v1981_v50, %v1981_v50 }
 0x179   :  { %v829_v19 = vadd.f32 %v828_v17, %v766_v62  ;;  %v696_v20 = vadd.f32 %v1973_v29, %v695_v13  ;;  %v771_v29 = vmul.f32 %v1985_v57, %v1985_v57  ;;  %v785_v13 = vmul.f32 %v2037_v8, %v2037_v8 }
 0x17b   :  { %v697_v23 = vadd.f32 %v696_v20, %v1983_v52  ;;  %v830_v25 = vadd.f32 %v829_v19, %v767_v5  ;;  %v772_v52 = vmul.f32 %v1995_v16, %v1995_v16 }
 0x17d   :  { %v831_v28 = vadd.f32 %v830_v25, %v768_v24  ;;  %v698_v33 = vadd.f32 %v697_v23, %v1989_v61 }
 0x17f   :  { %v699_v31 = vadd.f32 %v1981_v50, %v698_v33  ;;  %v832_v34 = vadd.f32 %v831_v28, %v769_v30  ;;  %v774_v50 = vmul.f32 %v1993_v14, %v1993_v14 }
 0x181   :  { %v833_v35 = vadd.f32 %v832_v34, %v770_v22  ;;  %v700_v36 = vadd.f32 %v1985_v57, %v699_v31  ;;  %v775_v57 = vmul.f32 %v1997_v21, %v1997_v21 }
 0x183   :  { %v701_v37 = vadd.f32 %v700_v36, %v1995_v16  ;;  %v834_v38 = vadd.f32 %v833_v35, %v771_v29  ;;  %v776_v16 = vmul.f32 %v2007_v47, %v2007_v47 }
 0x185   :  { %v835_v39 = vadd.f32 %v834_v38, %v772_v52  ;;  %v702_v61 = vadd.f32 %v701_v37, %v2001_v27 }
 0x187   :  { %v703_v42 = vadd.f32 %v1993_v14, %v702_v61  ;;  %v836_v46 = vadd.f32 %v835_v39, %v773_v40  ;;  %v778_v14 = vmul.f32 %v2005_v44, %v2005_v44 }
 0x189   :  { %v837_v48 = vadd.f32 %v836_v46, %v774_v50  ;;  %v704_v51 = vadd.f32 %v1997_v21, %v703_v42  ;;  %v779_v21 = vmul.f32 %v2009_v55, %v2009_v55 }
 0x18b   :  { %v705_v43 = vadd.f32 %v704_v51, %v2007_v47  ;;  %v838_v53 = vadd.f32 %v837_v48, %v775_v57  ;;  %v780_v47 = vmul.f32 %v2019_v18, %v2019_v18 }
 0x18d   :  { %v839_v56 = vadd.f32 %v838_v53, %v776_v16  ;;  %v706_v27 = vadd.f32 %v705_v43, %v2013_v60 }
 0x18f   :  { %v707_v49 = vadd.f32 %v2005_v44, %v706_v27  ;;  %v840_v63 = vadd.f32 %v839_v56, %v777_v59  ;;  %v782_v44 = vmul.f32 %v2017_v15, %v2017_v15 }
 0x191   :  { %v841_v41 = vadd.f32 %v840_v63, %v778_v14  ;;  %v708_v1 = vadd.f32 %v2009_v55, %v707_v49  ;;  %v783_v55 = vmul.f32 %v2021_v26, %v2021_v26 }
 0x193   :  { %v709_v2 = vadd.f32 %v708_v1, %v2019_v18  ;;  %v842_v45 = vadd.f32 %v841_v41, %v779_v21  ;;  %v784_v18 = vmul.f32 %v2031_v58, %v2031_v58 }
 0x195   :  { %v843_v4 = vadd.f32 %v842_v45, %v780_v47  ;;  %v710_v60 = vadd.f32 %v709_v2, %v2025_v32 }
 0x197   :  { %v711_v0 = vadd.f32 %v2017_v15, %v710_v60  ;;  %v844_v7 = vadd.f32 %v843_v4, %v781_v6  ;;  %v786_v15 = vmul.f32 %v2029_v54, %v2029_v54 }
 0x199   :  { %v845_v10 = vadd.f32 %v844_v7, %v782_v44  ;;  %v712_v11 = vadd.f32 %v2021_v26, %v711_v0  ;;  %v787_v26 = vmul.f32 %v2033_v3, %v2033_v3 }
 0x19b   :  { %v713_v9 = vadd.f32 %v712_v11, %v2031_v58  ;;  %v846_v12 = vadd.f32 %v845_v10, %v783_v55 }
 0x19d   :  { %v847_v62 = vadd.f32 %v846_v12, %v784_v18  ;;  %v714_v32 = vadd.f32 %v713_v9, %v2037_v8 }
 0x19f   :  { %v715_v17 = vadd.f32 %v2029_v54, %v714_v32  ;;  %v848_v5 = vadd.f32 %v847_v62, %v785_v13 }
 0x1a1   :  { %v716_v19 = vadd.f32 %v2033_v3, %v715_v17  ;;  %v849_v20 = vadd.f32 %v848_v5, %v786_v15 }
 0x1a3   :  { %v717_v58 = vrot.slane %v716_v19, 4  ;;  %v850_v24 = vadd.f32 %v849_v20, %v787_v26 }
 0x1a5   :  { %v851_v23 = vrot.slane %v850_v24, 4  ;;  %v718_v25 = vadd.f32 %v717_v58, %v716_v19 }
 0x1a7   :  { %v719_v28 = vrot.slane %v718_v25, 2  ;;  %v852_v33 = vadd.f32 %v851_v23, %v850_v24 }
 0x1a9   :  { %v720_v30 = vadd.f32 %v719_v28, %v718_v25  ;;  %v853_v8 = vrot.slane %v852_v33, 2 }
 0x1ab   :  { %v721_v22 = vrot.slane %v720_v30, 1  ;;  %v854_v31 = vadd.f32 %v853_v8, %v852_v33 }
 0x1ad   :  { %v722_v54 = vadd.f32 %v721_v22, %v720_v30  ;;  %v855_v34 = vrot.slane %v854_v31, 1 }
 0x1af   :  { %723 = vst [vmem:[#allocation8] sm:$0x1] %v722_v54  ;;  %v856_v3 = vadd.f32 %v855_v34, %v854_v31 }
 0x1b0   :  { %1842 = shalt.err (!%p1839_p0)
}
 0x1b1   :  { %s1843_s6 = scalar_lea.hbm %s2187_s3, 16 }
 0x1b2   :  { %p1844_p1 = scmp.ne.s32.totalorder %s2187_s3, %s1843_s6  ;;  %p1847_p2 = scmp.lt.u32.totalorder %s1843_s6, %s2187_s3 }
 0x1b4   :  { %p1849_p3 = pnand %p1847_p2, %p1844_p1 }
 0x1b6   :  { %1852 = shalt.err (!%p1849_p3)
}
 0x1b7   :  { %1199 = dma.vmem_to_hbm [thread:$0]  %s1197_s25, 16, %s2187_s3, [#allocation9]   ;;  %857 = vst [vmem:[#allocation10] sm:$0x1] %v856_v3 }
 0x1b8   :  { %s1853_s0 = scalar_lea.vmem %s2152_s27, 16  ;;  %s1857_s13 = scalar_lea.vmem %s2152_s27, 32 }
 0x1b9   :  { %p1854_p4 = scmp.ne.s32.totalorder %s2152_s27, %s1853_s0  ;;  %p1858_p5 = scmp.lt.s32.totalorder %s2152_s27, %s2152_s27 }
 0x1ba   :  { %p1859_p6 = scmp.lt.s32.totalorder %s1857_s13, %s1853_s0 }
 0x1bc   :  { %p1860_p7 = por %p1859_p6, %p1858_p5 }
 0x1be   :  { %p1861_p8 = pnand %p1860_p7, %p1854_p4 }
 0x1c0   :  { %1864 = shalt.err (!%p1861_p8)
}
 0x1c1   :  { %s1865_s15 = scalar_lea.hbm %s2188_s4, 16 }
 0x1c2   :  { %p1866_p9 = scmp.ne.s32.totalorder %s2188_s4, %s1865_s15  ;;  %p1869_p10 = scmp.lt.u32.totalorder %s1865_s15, %s2188_s4 }
 0x1c4   :  { %p1871_p11 = pnand %p1869_p10, %p1866_p9 }
 0x1c6   :  { %1874 = shalt.err (!%p1871_p11)
}
 0x1c7   :  { %1209 = dma.vmem_to_hbm [thread:$0]  %s2152_s27, 16, %s2188_s4, [#allocation9]  }
 0x1c8   :  { %1879 = dma.done.wait [#allocation4], 4096  }
 0x1c9   :  { %1880 = vsyncadd [#allocation4], 4294963200 }
 0x1ca   :  { %1881 = dma.done.wait [#allocation9], 32  }
 0x1cb   :  { %1882 = vsyncadd [#allocation9], 4294967264 }
 0x1cc   :  { %1219 = vsyncpa [#allocation3], 1 }
 0x1cd   :  { %1220 = vsyncpa [#allocation6], 1 }
 0x1ce   :  { %1221 = vsyncpa [#allocation4], 1 }
 0x1cf   :  { %1222 = vsyncpa [#allocation9], 1 }

</bundles_post_ra>
